<compile_context>
chip_gen: v7x
topology: tpu7x:2x2x1
jax: 0.10.0
libtpu: 0.0.40
codegen_flags: <defaults>
</compile_context>

<pallas_src>
import jax
import jax.numpy as jnp
from jax.experimental import pallas as pl
from jax.experimental.pallas import tpu as pltpu

INPUT_SIZE = 5
OUTPUT_SIZE = 2
LANE_TILE = 128  # batch rows per block on the lane axis for the tiled path


def _linear_vpu_kernel(x_ref, w_ref, b_ref, o_ref):
    """Gridless small-batch path.

    x_ref: (B, K)   w_ref: (K, N)   b_ref: (1, N)   o_ref: (B, N)
    K and N are tiny compile-time constants, so the contraction is fully
    unrolled as VPU multiply-adds (no MXU dispatch).
    """
    x = x_ref[...]
    w = w_ref[...]
    k_dim = x.shape[1]
    acc = jnp.broadcast_to(b_ref[...], (x.shape[0], w.shape[1])).astype(jnp.float32)
    for k in range(k_dim):  # K == 5 -> fully unrolled at trace time
        acc = acc + x[:, k:k + 1] * w[k:k + 1, :]
    o_ref[...] = acc.astype(o_ref.dtype)


def _linear_lane_dense_kernel(xt_ref, w_ref, b_ref, ot_ref):
    """Batch-tiled, lane-dense path (batch mapped to the 128-lane axis).

    xt_ref: (K, TB)   w_ref: (N, K)   b_ref: (N, 1)   ot_ref: (N, TB)
    Computes y^T = W @ x^T + b with unrolled VPU FMAs; the output's last dim
    is a multiple of 128 so stores are unmasked.
    """
    xt = xt_ref[...]
    w = w_ref[...]
    k_dim = xt.shape[0]
    acc = jnp.broadcast_to(b_ref[...], (w.shape[0], xt.shape[1])).astype(jnp.float32)
    for k in range(k_dim):  # K == 5 -> fully unrolled at trace time
        acc = acc + w[:, k:k + 1] * xt[k:k + 1, :]
    ot_ref[...] = acc.astype(ot_ref.dtype)


def linear_forward(x, weight, bias):
    """Equivalent of nn.Linear: y = x @ weight.T + bias.

    x:      (B, INPUT_SIZE)            float32
    weight: (OUTPUT_SIZE, INPUT_SIZE)  float32  (PyTorch convention)
    bias:   (OUTPUT_SIZE,)             float32
    """
    B, in_features = x.shape
    out_features = weight.shape[0]

    if B >= LANE_TILE and B % LANE_TILE == 0:
        # Large-batch path: batch on the lane axis, tiled over a 1-D grid.
        # Weight/bias BlockSpecs return (0, 0) so they stay VMEM-resident
        # across all grid steps; weight is used in its native (N, K) layout.
        xt = x.T                                   # (K, B) — layout plumbing in plain JAX
        b2d = bias.reshape(out_features, 1)        # (N, 1)
        out_t = pl.pallas_call(
            _linear_lane_dense_kernel,
            out_shape=jax.ShapeDtypeStruct((out_features, B), x.dtype),
            grid=(B // LANE_TILE,),
            in_specs=[
                pl.BlockSpec((in_features, LANE_TILE), lambda i: (0, i)),
                pl.BlockSpec((out_features, in_features), lambda i: (0, 0)),
                pl.BlockSpec((out_features, 1), lambda i: (0, 0)),
            ],
            out_specs=pl.BlockSpec((out_features, LANE_TILE), lambda i: (0, i)),
            compiler_params=pltpu.CompilerParams(
                dimension_semantics=("parallel",)),   # shards across v7x's 2 TCs
        )(xt, weight, b2d)
        return out_t.T

    # Small-batch path: no grid at all (a 1-point grid would still instantiate
    # the software pipeline); whole arrays live in VMEM.
    w_t = weight.T                          # (K, N)
    b2d = bias.reshape(1, out_features)     # (1, N)
    return pl.pallas_call(
        _linear_vpu_kernel,
        out_shape=jax.ShapeDtypeStruct((B, out_features), x.dtype),
        in_specs=[
            pl.BlockSpec(memory_space=pltpu.MemorySpace.VMEM),
            pl.BlockSpec(memory_space=pltpu.MemorySpace.VMEM),
            pl.BlockSpec(memory_space=pltpu.MemorySpace.VMEM),
        ],
        out_specs=pl.BlockSpec(memory_space=pltpu.MemorySpace.VMEM),
    )(x, w_t, b2d)


def init_params(key, in_features, out_features):
    # Deterministic init mimicking nn.Linear default: U(-1/sqrt(in), 1/sqrt(in)).
    kw, kb = jax.random.split(key)
    bound = 1.0 / jnp.sqrt(jnp.float32(in_features))
    weight = jax.random.uniform(
        kw, (out_features, in_features), jnp.float32, -bound, bound)
    bias = jax.random.uniform(
        kb, (out_features,), jnp.float32, -bound, bound)
    return weight, bias


if __name__ == "__main__":
    key = jax.random.PRNGKey(0)
    k_x, k_p, k_x2 = jax.random.split(key, 3)

    weight, bias = init_params(k_p, INPUT_SIZE, OUTPUT_SIZE)

    # Small-batch example (matches the module's tiny Linear(5, 2)).
    batch = 8
    x = jax.random.normal(k_x, (batch, INPUT_SIZE), jnp.float32)
    out = jax.block_until_ready(linear_forward(x, weight, bias))

    # Mirror of the PyTorch module's print inside forward (host-side).
    print("\tIn Model: input size", x.shape, "output size", out.shape)

    ref = x @ weight.T + bias
    assert out.shape == (batch, OUTPUT_SIZE)
    assert jnp.allclose(out, ref, atol=1e-5), "small-batch mismatch vs reference"

    # Larger batch exercises the lane-dense, batch-tiled path.
    big_batch = 2 * LANE_TILE
    xb = jax.random.normal(k_x2, (big_batch, INPUT_SIZE), jnp.float32)
    out_b = jax.block_until_ready(linear_forward(xb, weight, bias))
    ref_b = xb @ weight.T + bias
    assert out_b.shape == (big_batch, OUTPUT_SIZE)
    assert jnp.allclose(out_b, ref_b, atol=1e-5), "tiled-batch mismatch vs reference"

    print("KERNEL_OK")
</pallas_src>

<mosaic_0001>
module attributes {stable_mosaic.version = 11 : i64} {
  func.func @_linear_vpu_kernel(%arg0: memref<8x5xf32, #tpu.memory_space<vmem>>, %arg1: memref<5x2xf32, #tpu.memory_space<vmem>>, %arg2: memref<1x2xf32, #tpu.memory_space<vmem>>, %arg3: memref<8x2xf32, #tpu.memory_space<vmem>>) attributes {dimension_semantics = [], scalar_prefetch = 0 : i64, scratch_operands = 0 : i64, tpu.core_type = #tpu.core_type<tc>} {
    %c0 = arith.constant 0 : index
    %c0_0 = arith.constant 0 : index
    %0 = vector.load %arg0[%c0, %c0_0] : memref<8x5xf32, #tpu.memory_space<vmem>>, vector<8x5xf32>
    %c0_1 = arith.constant 0 : index
    %c0_2 = arith.constant 0 : index
    %1 = vector.load %arg1[%c0_1, %c0_2] : memref<5x2xf32, #tpu.memory_space<vmem>>, vector<5x2xf32>
    %c0_3 = arith.constant 0 : index
    %c0_4 = arith.constant 0 : index
    %2 = vector.load %arg2[%c0_3, %c0_4] : memref<1x2xf32, #tpu.memory_space<vmem>>, vector<1x2xf32>
    %3 = vector.shape_cast %2 : vector<1x2xf32> to vector<1x2xf32>
    %4 = vector.broadcast %3 : vector<1x2xf32> to vector<8x2xf32>
    %5 = vector.extract_strided_slice %0 {offsets = [0, 0], sizes = [8, 1], strides = [1, 1]} : vector<8x5xf32> to vector<8x1xf32>
    %6 = vector.extract_strided_slice %1 {offsets = [0, 0], sizes = [1, 2], strides = [1, 1]} : vector<5x2xf32> to vector<1x2xf32>
    %7 = vector.broadcast %5 : vector<8x1xf32> to vector<8x2xf32>
    %8 = vector.broadcast %6 : vector<1x2xf32> to vector<8x2xf32>
    %9 = arith.mulf %7, %8 : vector<8x2xf32>
    %10 = arith.addf %4, %9 : vector<8x2xf32>
    %11 = vector.extract_strided_slice %0 {offsets = [0, 1], sizes = [8, 1], strides = [1, 1]} : vector<8x5xf32> to vector<8x1xf32>
    %12 = vector.extract_strided_slice %1 {offsets = [1, 0], sizes = [1, 2], strides = [1, 1]} : vector<5x2xf32> to vector<1x2xf32>
    %13 = vector.broadcast %11 : vector<8x1xf32> to vector<8x2xf32>
    %14 = vector.broadcast %12 : vector<1x2xf32> to vector<8x2xf32>
    %15 = arith.mulf %13, %14 : vector<8x2xf32>
    %16 = arith.addf %10, %15 : vector<8x2xf32>
    %17 = vector.extract_strided_slice %0 {offsets = [0, 2], sizes = [8, 1], strides = [1, 1]} : vector<8x5xf32> to vector<8x1xf32>
    %18 = vector.extract_strided_slice %1 {offsets = [2, 0], sizes = [1, 2], strides = [1, 1]} : vector<5x2xf32> to vector<1x2xf32>
    %19 = vector.broadcast %17 : vector<8x1xf32> to vector<8x2xf32>
    %20 = vector.broadcast %18 : vector<1x2xf32> to vector<8x2xf32>
    %21 = arith.mulf %19, %20 : vector<8x2xf32>
    %22 = arith.addf %16, %21 : vector<8x2xf32>
    %23 = vector.extract_strided_slice %0 {offsets = [0, 3], sizes = [8, 1], strides = [1, 1]} : vector<8x5xf32> to vector<8x1xf32>
    %24 = vector.extract_strided_slice %1 {offsets = [3, 0], sizes = [1, 2], strides = [1, 1]} : vector<5x2xf32> to vector<1x2xf32>
    %25 = vector.broadcast %23 : vector<8x1xf32> to vector<8x2xf32>
    %26 = vector.broadcast %24 : vector<1x2xf32> to vector<8x2xf32>
    %27 = arith.mulf %25, %26 : vector<8x2xf32>
    %28 = arith.addf %22, %27 : vector<8x2xf32>
    %29 = vector.extract_strided_slice %0 {offsets = [0, 4], sizes = [8, 1], strides = [1, 1]} : vector<8x5xf32> to vector<8x1xf32>
    %30 = vector.extract_strided_slice %1 {offsets = [4, 0], sizes = [1, 2], strides = [1, 1]} : vector<5x2xf32> to vector<1x2xf32>
    %31 = vector.broadcast %29 : vector<8x1xf32> to vector<8x2xf32>
    %32 = vector.broadcast %30 : vector<1x2xf32> to vector<8x2xf32>
    %33 = arith.mulf %31, %32 : vector<8x2xf32>
    %34 = arith.addf %28, %33 : vector<8x2xf32>
    %c0_5 = arith.constant 0 : index
    %c0_6 = arith.constant 0 : index
    %35 = vector.load %arg3[%c0_5, %c0_6] : memref<8x2xf32, #tpu.memory_space<vmem>>, vector<8x2xf32>
    tpu.vector_store %arg3[%c0_5, %c0_6], %34 {strides = array<i32>} : memref<8x2xf32, #tpu.memory_space<vmem>>, vector<8x2xf32>,
    return
  }
}

</mosaic_0001>

<bundles_post_ra>
// kernel: tpu_custom_call.1
= control target key start
LH: loop header
LB: loop body
LE: loop exit
PB: predicated region body
PF: predicated region fallthrough
CT: control target
= control target key end

     0   :  { %v92_v0 = vmov 0   ;;  %v93_v1 = vmov 2   ;;  %v94_v3 = vmov 1   ;;  %v95_v4 = vmov 3   ;;  %s129_s0 = inlined_call_operand.vmem [shape: f32[8,5], index: 0, kind: input, shape index: {}]   ;;  %s130_s1 = inlined_call_operand.vmem [shape: f32[5,2], index: 1, kind: input, shape index: {}]   ;;  %s131_s2 = inlined_call_operand.vmem [shape: f32[1,2], index: 2, kind: input, shape index: {}]   ;;  %s132_s3 = inlined_call_operand.vmem [shape: f32[8,2], index: 3, kind: output, shape index: {}]  }
   0x1   :  { %86 = vset.pattern.permute.xlu0 %v92_v0  ;;  %88 = vset.pattern.permute.xlu1 %v93_v1  ;;  %v14_v2 = vld [vmem:[%s129_s0] sm:$0xff]  ;;  %v96_v5 = vmov 4   ;;  %v28_v6 = vlaneseq  ;;  %vm74_vm0 = vcmask 15360  }
   0x2   :  { %25 = vperm.xlu0 %86, %v14_v2   ;;  %45 = vperm.xlu1 %88, %v14_v2   ;;  %v15_v9 = vld [vmem:[%s130_s1] sm:$0x1f] }
   0x3   :  { %v29_v7 = vshrl.u32 %v28_v6, 7  ;;  %v80_v18 = vld [vmem:[%s131_s2] ss:$0 sm:$0xff] }
   0x5   :  { %v30_v8 = vsub.s32 0, %v29_v7  ;;  %v40_v11 = vsub.s32 1, %v29_v7  ;;  %v50_v13 = vsub.s32 2, %v29_v7  ;;  %v60_v17 = vsub.s32 3, %v29_v7 }
   0x6   :  { %87 = vset.pattern.permute.xlu0 %v94_v3  ;;  %89 = vset.pattern.permute.xlu1 %v95_v4  ;;  %v70_v19 = vsub.s32 4, %v29_v7 }
   0x7   :  { %35 = vperm.xlu0 %87, %v14_v2   ;;  %55 = vperm.xlu1 %89, %v14_v2   ;;  %v31_v10 = vrot.slane %v15_v9, %v30_v8  ;;  %v41_v16 = vrot.slane %v15_v9, %v40_v11  ;;  %v51_v20 = vrot.slane %v15_v9, %v50_v13 }
   0x8   :  { %v61_v25 = vrot.slane %v15_v9, %v60_v17  ;;  %v71_v26 = vrot.slane %v15_v9, %v70_v19 }
   0xb   :  { %90 = vset.pattern.permute.xlu1 %v96_v5  ;;  %91 = vset.pattern.permute.xlu0 %v96_v5 }
   0xc   :  { %65 = vperm.xlu1 %90, %v14_v2  }
  0x81   :  { %v26_v12 = vpop.permute.xlu0 %25  ;;  %v46_v14 = vpop.permute.xlu1 %45 }
  0x82   :  { %v32_v15 = vmul.f32 %v31_v10, %v26_v12  ;;  %v52_v27 = vmul.f32 %v51_v20, %v46_v14 }
  0x84   :  { %v33_v23 = vadd.f32 %v80_v18, %v32_v15 }
  0x86   :  { %v36_v21 = vpop.permute.xlu0 %35  ;;  %v56_v22 = vpop.permute.xlu1 %55 }
  0x87   :  { %v42_v24 = vmul.f32 %v41_v16, %v36_v21  ;;  %v62_v30 = vmul.f32 %v61_v25, %v56_v22 }
  0x89   :  { %v43_v28 = vadd.f32 %v42_v24, %v33_v23 }
  0x8b   :  { %v53_v29 = vadd.f32 %v52_v27, %v43_v28  ;;  %v66_v31 = vpop.permute.xlu1 %65 }
  0x8c   :  { %v72_v32 = vmul.f32 %v71_v26, %v66_v31 }
  0x8d   :  { %v63_v33 = vadd.f32 %v62_v30, %v53_v29 }
  0x8f   :  { %v73_v34 = vadd.f32 %v72_v32, %v63_v33 }
  0x91   :  { %75 = vst.msk [vmem:[%s132_s3] sm:$0xff] %vm74_vm0, %v73_v34 }

</bundles_post_ra>
